<compile_context>
chip_gen: v6e
topology: v6e:2x2x1
jax: 0.10.0
libtpu: 0.0.40
codegen_flags: <defaults>
</compile_context>

<pallas_src>
import functools

import jax
import jax.numpy as jnp
from jax import lax
from jax.experimental import pallas as pl
from jax.experimental.pallas import tpu as pltpu


def _global_attention_kernel(*refs, attn_type):
    if attn_type == "general":
        (q_ref, ctx_ref, w_in_t_ref, w_c_t_ref, w_q_t_ref,
         attn_h_ref, align_ref) = refs
    else:  # 'dot'
        q_ref, ctx_ref, w_c_t_ref, w_q_t_ref, attn_h_ref, align_ref = refs
        w_in_t_ref = None

    q = q_ref[...]          # (bb, T, D)  native dtype (f32 or bf16)
    ctx = ctx_ref[...]      # (bb, S, D)
    bb, T, D = q.shape

    # ---- score projection (linear_in) — one (bb*T, D) matmul ---------------
    if attn_type == "general":
        q_s = jnp.dot(q.reshape(bb * T, D), w_in_t_ref[...],
                      preferred_element_type=jnp.float32)
        q_s = q_s.reshape(bb, T, D).astype(q.dtype)
    else:
        q_s = q

    # ---- scores (bb, T, S): contract ctx's feature dim directly (no ctx.T) -
    scores = lax.dot_general(
        q_s, ctx,
        dimension_numbers=(((2,), (2,)), ((0,), (0,))),
        preferred_element_type=jnp.float32)

    # ---- numerically stable softmax over src_len (f32) ---------------------
    m = jnp.max(scores, axis=-1, keepdims=True)
    e = jnp.exp(scores - m)
    denom = jnp.sum(e, axis=-1, keepdims=True)
    # exact reciprocal: `align` is an exported output, keep 1e-5 accuracy
    attn = e * pl.reciprocal(denom, approx=False)        # (bb, T, S) f32

    # ---- context vectors: c = attn @ ctx (batched) --------------------------
    c = lax.dot_general(
        attn.astype(ctx.dtype), ctx,
        dimension_numbers=(((2,), (1,)), ((0,), (0,))),
        preferred_element_type=jnp.float32)               # (bb, T, D) f32

    # ---- linear_out([c, q]) == c @ Wc^T + q @ Wq^T (no concat) -------------
    h = (jnp.dot(c.astype(q.dtype).reshape(bb * T, D), w_c_t_ref[...],
                 preferred_element_type=jnp.float32)
         + jnp.dot(q.reshape(bb * T, D), w_q_t_ref[...],
                   preferred_element_type=jnp.float32))
    attn_h = jnp.tanh(h).reshape(bb, T, D)

    # ---- write outputs directly in the (tgt_len, batch, ·) layout ----------
    attn_h_ref[...] = jnp.transpose(attn_h, (1, 0, 2)).astype(attn_h_ref.dtype)
    align_ref[...] = jnp.transpose(attn, (1, 0, 2)).astype(align_ref.dtype)


def _block_vmem_bytes(bb, T, S, D, itemsize):
    """Rough VMEM footprint of one grid step (inputs/outputs double-buffered)."""
    f32 = 4
    io = (bb * T * D * itemsize          # query block
          + bb * S * D * itemsize        # context block
          + 3 * D * D * itemsize         # weight blocks
          + bb * T * D * itemsize        # attn_h out block
          + bb * T * S * f32)            # align out block (f32)
    live = f32 * (2 * bb * T * S + 3 * bb * T * D)   # scores/attn + q_s/c/h temps
    return 2 * io + live


def _pick_batch_block(N, T, S, D, itemsize):
    """Largest divisor of N that keeps one block well inside scoped VMEM and is
    layout-legal as the second-to-last output dim (bb == N or bb % 8 == 0)."""
    budget = 12 * 2 ** 20
    legal = [bb for bb in range(1, N + 1)
             if N % bb == 0 and (bb == N or bb % 8 == 0)]
    fitting = [bb for bb in legal
               if _block_vmem_bytes(bb, T, S, D, itemsize) <= budget]
    pool = fitting if fitting else legal[:1]
    best = pool[0]
    for bb in pool:
        best = bb
        if bb * T >= 256:      # enough MXU rows; no need to grow further
            break
    return best


def global_attention(query, context, w_in, w_out, *, attn_type="general",
                     batch_block=None):
    """Pallas equivalent of GlobalAttention.forward.

    query:   (N, tgt_len, dim)  or  (N, dim)   (one-step case)
    context: (N, src_len, dim)
    w_in:    (dim, dim)      PyTorch linear_in.weight  (unused for 'dot')
    w_out:   (dim, 2*dim)    PyTorch linear_out.weight
    Returns (attn_h, align_vectors) with PyTorch output layouts.
    """
    assert attn_type in ("dot", "general")
    one_step = query.ndim == 2
    if one_step:
        query = query[:, None, :]

    N, T, D = query.shape
    _, S, _ = context.shape

    # Hoist all weight transposes / splits out of the kernel (done once in XLA).
    w_c_t = jnp.transpose(w_out[:, :D])      # (D, D)   c-half of linear_out
    w_q_t = jnp.transpose(w_out[:, D:])      # (D, D)   q-half of linear_out

    bb = batch_block or _pick_batch_block(N, T, S, D, query.dtype.itemsize)
    assert N % bb == 0, "batch_block must divide the batch size"
    grid = (N // bb,)

    kernel = functools.partial(_global_attention_kernel, attn_type=attn_type)

    weight_spec = pl.BlockSpec((D, D), lambda b: (0, 0))
    in_specs = [
        pl.BlockSpec((bb, T, D), lambda b: (b, 0, 0)),   # query block
        pl.BlockSpec((bb, S, D), lambda b: (b, 0, 0)),   # context block
    ]
    operands = [query, context]
    if attn_type == "general":
        in_specs.append(weight_spec)
        operands.append(jnp.transpose(w_in))             # (D, D)
    in_specs += [weight_spec, weight_spec]
    operands += [w_c_t, w_q_t]

    vmem_limit = int(min(48 * 2 ** 20,
                         max(32 * 2 ** 20,
                             2 * _block_vmem_bytes(bb, T, S, D,
                                                   query.dtype.itemsize))))

    attn_h, align = pl.pallas_call(
        kernel,
        out_shape=(
            jax.ShapeDtypeStruct((T, N, D), query.dtype),
            jax.ShapeDtypeStruct((T, N, S), jnp.float32),   # align kept in f32
        ),
        grid=grid,
        in_specs=in_specs,
        out_specs=(
            pl.BlockSpec((T, bb, D), lambda b: (0, b, 0)),
            pl.BlockSpec((T, bb, S), lambda b: (0, b, 0)),
        ),
        compiler_params=pltpu.CompilerParams(
            dimension_semantics=("parallel",),
            vmem_limit_bytes=vmem_limit),
    )(*operands)

    if one_step:
        return attn_h[0], align[0]
    return attn_h, align


def _reference(query, context, w_in, w_out, attn_type):
    # pure-JAX reference for correctness checking
    one_step = query.ndim == 2
    if one_step:
        query = query[:, None, :]
    q = query
    if attn_type == "general":
        q_s = jnp.einsum("ntd,ed->nte", q, w_in)
    else:
        q_s = q
    scores = jnp.einsum("ntd,nsd->nts", q_s, context)
    attn = jax.nn.softmax(scores, axis=-1)
    c = jnp.einsum("nts,nsd->ntd", attn, context)
    cat = jnp.concatenate([c, q], axis=-1)
    attn_h = jnp.tanh(jnp.einsum("ntk,dk->ntd", cat, w_out))
    if one_step:
        return attn_h[:, 0, :], attn[:, 0, :]
    return jnp.transpose(attn_h, (1, 0, 2)), jnp.transpose(attn, (1, 0, 2))


if __name__ == "__main__":
    key = jax.random.PRNGKey(0)
    k_q, k_c, k_wi, k_wo, k_q1 = jax.random.split(key, 5)

    N, T, S, D = 2, 8, 8, 32
    query = jax.random.normal(k_q, (N, T, D), dtype=jnp.float32)
    context = jax.random.normal(k_c, (N, S, D), dtype=jnp.float32)
    # PyTorch Linear weight shapes, no bias
    w_in = jax.random.normal(k_wi, (D, D), dtype=jnp.float32) * (1.0 / D ** 0.5)
    w_out = jax.random.normal(k_wo, (D, 2 * D), dtype=jnp.float32) * (1.0 / (2 * D) ** 0.5)

    # 3-D query, 'general' attention
    attn_h, align = global_attention(query, context, w_in, w_out,
                                     attn_type="general")
    jax.block_until_ready((attn_h, align))
    ref_h, ref_a = _reference(query, context, w_in, w_out, "general")
    assert attn_h.shape == (T, N, D) and align.shape == (T, N, S)
    assert jnp.allclose(attn_h, ref_h, atol=1e-5, rtol=1e-5)
    assert jnp.allclose(align, ref_a, atol=1e-5, rtol=1e-5)

    # one-step (2-D) query, 'dot' attention (w_in neither used nor DMA'd)
    q1 = jax.random.normal(k_q1, (N, D), dtype=jnp.float32)
    attn_h1, align1 = global_attention(q1, context, w_in, w_out,
                                       attn_type="dot")
    jax.block_until_ready((attn_h1, align1))
    ref_h1, ref_a1 = _reference(q1, context, w_in, w_out, "dot")
    assert attn_h1.shape == (N, D) and align1.shape == (N, S)
    assert jnp.allclose(attn_h1, ref_h1, atol=1e-5, rtol=1e-5)
    assert jnp.allclose(align1, ref_a1, atol=1e-5, rtol=1e-5)

    print("KERNEL_OK")
</pallas_src>

<mosaic_0001>
module attributes {stable_mosaic.version = 11 : i64} {
  func.func @_global_attention_kernel(%arg0: i32, %arg1: memref<2x8x32xf32, #tpu.memory_space<vmem>>, %arg2: memref<2x8x32xf32, #tpu.memory_space<vmem>>, %arg3: memref<32x32xf32, #tpu.memory_space<vmem>>, %arg4: memref<32x32xf32, #tpu.memory_space<vmem>>, %arg5: memref<32x32xf32, #tpu.memory_space<vmem>>, %arg6: memref<8x2x32xf32, #tpu.memory_space<vmem>>, %arg7: memref<8x2x8xf32, #tpu.memory_space<vmem>>) attributes {dimension_semantics = [#tpu.dimension_semantics<parallel>], iteration_bounds = array<i64: 1>, scalar_prefetch = 0 : i64, scratch_operands = 0 : i64, tpu.core_type = #tpu.core_type<tc>, window_params = [{transform_indices = @transform_0, window_bounds = array<i64: 2, 8, 32>}, {transform_indices = @transform_1, window_bounds = array<i64: 2, 8, 32>}, {pipeline_mode = #tpu.pipeline_mode<synchronous>, transform_indices = @transform_2, window_bounds = array<i64: 32, 32>}, {pipeline_mode = #tpu.pipeline_mode<synchronous>, transform_indices = @transform_3, window_bounds = array<i64: 32, 32>}, {pipeline_mode = #tpu.pipeline_mode<synchronous>, transform_indices = @transform_4, window_bounds = array<i64: 32, 32>}, {transform_indices = @transform_5, window_bounds = array<i64: 8, 2, 32>}, {transform_indices = @transform_6, window_bounds = array<i64: 8, 2, 8>}]} {
    %c0 = arith.constant 0 : index
    %c0_0 = arith.constant 0 : index
    %c0_1 = arith.constant 0 : index
    %0 = vector.load %arg1[%c0, %c0_0, %c0_1] : memref<2x8x32xf32, #tpu.memory_space<vmem>>, vector<2x8x32xf32>
    %c0_2 = arith.constant 0 : index
    %c0_3 = arith.constant 0 : index
    %c0_4 = arith.constant 0 : index
    %1 = vector.load %arg2[%c0_2, %c0_3, %c0_4] : memref<2x8x32xf32, #tpu.memory_space<vmem>>, vector<2x8x32xf32>
    %2 = vector.shape_cast %0 : vector<2x8x32xf32> to vector<16x32xf32>
    %c0_5 = arith.constant 0 : index
    %c0_6 = arith.constant 0 : index
    %3 = vector.load %arg3[%c0_5, %c0_6] : memref<32x32xf32, #tpu.memory_space<vmem>>, vector<32x32xf32>
    %cst = arith.constant dense<0.000000e+00> : vector<16x32xf32>
    %4 = tpu.matmul %2, %3, %cst {dimension_numbers = #tpu.dot_dimension_numbers<[1], [0], [0], [1], [0, 0, 1, 1], [], []>} : vector<16x32xf32>, vector<32x32xf32>, vector<16x32xf32> -> vector<16x32xf32>
    %5 = vector.shape_cast %4 : vector<16x32xf32> to vector<2x8x32xf32>
    %cst_7 = arith.constant dense<0.000000e+00> : vector<2x8x8xf32>
    %6 = tpu.matmul %5, %1, %cst_7 {dimension_numbers = #tpu.dot_dimension_numbers<[2], [2], [1], [1], [0, 0, 0, 1, 1, 1], [0], [0]>} : vector<2x8x32xf32>, vector<2x8x32xf32>, vector<2x8x8xf32> -> vector<2x8x8xf32>
    %cst_8 = arith.constant dense<0xFF800000> : vector<2x8xf32>
    %7 = vector.multi_reduction <maximumf>, %6, %cst_8 [2] : vector<2x8x8xf32> to vector<2x8xf32>
    %8 = vector.shape_cast %7 : vector<2x8xf32> to vector<2x8x1xf32>
    %9 = vector.broadcast %8 : vector<2x8x1xf32> to vector<2x8x8xf32>
    %10 = arith.subf %6, %9 : vector<2x8x8xf32>
    %11 = math.exp %10 : vector<2x8x8xf32>
    %cst_9 = arith.constant dense<0.000000e+00> : vector<2x8xf32>
    %12 = vector.multi_reduction <add>, %11, %cst_9 [2] : vector<2x8x8xf32> to vector<2x8xf32>
    %13 = vector.shape_cast %12 : vector<2x8xf32> to vector<2x8x1xf32>
    %14 = tpu.reciprocal %13 : vector<2x8x1xf32> -> vector<2x8x1xf32>
    %15 = vector.broadcast %14 : vector<2x8x1xf32> to vector<2x8x8xf32>
    %16 = arith.mulf %11, %15 : vector<2x8x8xf32>
    %cst_10 = arith.constant dense<0.000000e+00> : vector<2x8x32xf32>
    %17 = tpu.matmul %16, %1, %cst_10 {dimension_numbers = #tpu.dot_dimension_numbers<[2], [1], [1], [2], [0, 0, 0, 1, 1, 2], [0], [0]>} : vector<2x8x8xf32>, vector<2x8x32xf32>, vector<2x8x32xf32> -> vector<2x8x32xf32>
    %18 = vector.shape_cast %17 : vector<2x8x32xf32> to vector<16x32xf32>
    %c0_11 = arith.constant 0 : index
    %c0_12 = arith.constant 0 : index
    %19 = vector.load %arg4[%c0_11, %c0_12] : memref<32x32xf32, #tpu.memory_space<vmem>>, vector<32x32xf32>
    %cst_13 = arith.constant dense<0.000000e+00> : vector<16x32xf32>
    %20 = tpu.matmul %18, %19, %cst_13 {dimension_numbers = #tpu.dot_dimension_numbers<[1], [0], [0], [1], [0, 0, 1, 1], [], []>} : vector<16x32xf32>, vector<32x32xf32>, vector<16x32xf32> -> vector<16x32xf32>
    %21 = vector.shape_cast %0 : vector<2x8x32xf32> to vector<16x32xf32>
    %c0_14 = arith.constant 0 : index
    %c0_15 = arith.constant 0 : index
    %22 = vector.load %arg5[%c0_14, %c0_15] : memref<32x32xf32, #tpu.memory_space<vmem>>, vector<32x32xf32>
    %cst_16 = arith.constant dense<0.000000e+00> : vector<16x32xf32>
    %23 = tpu.matmul %21, %22, %cst_16 {dimension_numbers = #tpu.dot_dimension_numbers<[1], [0], [0], [1], [0, 0, 1, 1], [], []>} : vector<16x32xf32>, vector<32x32xf32>, vector<16x32xf32> -> vector<16x32xf32>
    %24 = arith.addf %20, %23 : vector<16x32xf32>
    %25 = math.tanh %24 : vector<16x32xf32>
    %26 = vector.shape_cast %25 : vector<16x32xf32> to vector<2x8x32xf32>
    %27 = tpu.transpose %26, [1, 0, 2] : vector<2x8x32xf32> -> vector<8x2x32xf32>
    %c0_17 = arith.constant 0 : index
    %c0_18 = arith.constant 0 : index
    %c0_19 = arith.constant 0 : index
    %28 = vector.load %arg6[%c0_17, %c0_18, %c0_19] : memref<8x2x32xf32, #tpu.memory_space<vmem>>, vector<8x2x32xf32>
    tpu.vector_store %arg6[%c0_17, %c0_18, %c0_19], %27 {strides = array<i32>} : memref<8x2x32xf32, #tpu.memory_space<vmem>>, vector<8x2x32xf32>,
    %29 = tpu.transpose %16, [1, 0, 2] : vector<2x8x8xf32> -> vector<8x2x8xf32>
    %c0_20 = arith.constant 0 : index
    %c0_21 = arith.constant 0 : index
    %c0_22 = arith.constant 0 : index
    %30 = vector.load %arg7[%c0_20, %c0_21, %c0_22] : memref<8x2x8xf32, #tpu.memory_space<vmem>>, vector<8x2x8xf32>
    tpu.vector_store %arg7[%c0_20, %c0_21, %c0_22], %29 {strides = array<i32>} : memref<8x2x8xf32, #tpu.memory_space<vmem>>, vector<8x2x8xf32>,
    return
  }
  func.func @transform_0(%arg0: i32) -> (i32, i32, i32) {
    %c0_i32 = arith.constant 0 : i32
    %c0_i32_0 = arith.constant 0 : i32
    %c0_i32_1 = arith.constant 0 : i32
    return %arg0, %c0_i32, %c0_i32_0 : i32, i32, i32
  }
  func.func @transform_1(%arg0: i32) -> (i32, i32, i32) {
    %c0_i32 = arith.constant 0 : i32
    %c0_i32_0 = arith.constant 0 : i32
    %c0_i32_1 = arith.constant 0 : i32
    return %arg0, %c0_i32, %c0_i32_0 : i32, i32, i32
  }
  func.func @transform_2(%arg0: i32) -> (i32, i32) {
    %c0_i32 = arith.constant 0 : i32
    %c0_i32_0 = arith.constant 0 : i32
    %c0_i32_1 = arith.constant 0 : i32
    return %c0_i32, %c0_i32_0 : i32, i32
  }
  func.func @transform_3(%arg0: i32) -> (i32, i32) {
    %c0_i32 = arith.constant 0 : i32
    %c0_i32_0 = arith.constant 0 : i32
    %c0_i32_1 = arith.constant 0 : i32
    return %c0_i32, %c0_i32_0 : i32, i32
  }
  func.func @transform_4(%arg0: i32) -> (i32, i32) {
    %c0_i32 = arith.constant 0 : i32
    %c0_i32_0 = arith.constant 0 : i32
    %c0_i32_1 = arith.constant 0 : i32
    return %c0_i32, %c0_i32_0 : i32, i32
  }
  func.func @transform_5(%arg0: i32) -> (i32, i32, i32) {
    %c0_i32 = arith.constant 0 : i32
    %c0_i32_0 = arith.constant 0 : i32
    %c0_i32_1 = arith.constant 0 : i32
    return %c0_i32, %arg0, %c0_i32_0 : i32, i32, i32
  }
  func.func @transform_6(%arg0: i32) -> (i32, i32, i32) {
    %c0_i32 = arith.constant 0 : i32
    %c0_i32_0 = arith.constant 0 : i32
    %c0_i32_1 = arith.constant 0 : i32
    return %c0_i32, %arg0, %c0_i32_0 : i32, i32, i32
  }
}

</mosaic_0001>

<bundles_post_ra>
// kernel: tpu_custom_call.1
= control target key start
LH: loop header
LB: loop body
LE: loop exit
PB: predicated region body
PF: predicated region fallthrough
CT: control target
= control target key end

     0   :  { %12 = vsyncpa [#allocation3], 0  ;;  %s1294_s0 = inlined_call_operand.hbm [shape: f32[2,8,32], index: 0, kind: input, shape index: {}]   ;;  %s1295_s1 = inlined_call_operand.hbm [shape: f32[2,8,32], index: 1, kind: input, shape index: {}]   ;;  %s1296_s2 = inlined_call_operand.hbm [shape: f32[32,32], index: 2, kind: input, shape index: {}]   ;;  %s1297_s3 = inlined_call_operand.hbm [shape: f32[32,32], index: 3, kind: input, shape index: {}]   ;;  %s1298_s4 = inlined_call_operand.hbm [shape: f32[32,32], index: 4, kind: input, shape index: {}]   ;;  %s1299_s5 = inlined_call_operand.hbm [shape: f32[8,2,32], index: 5, kind: output, shape index: {0}]   ;;  %s1300_s6 = inlined_call_operand.hbm [shape: f32[8,2,8], index: 6, kind: output, shape index: {1}]  }
   0x1   :  { %13 = vsyncpa [#allocation6], 0 }
   0x2   :  { %14 = vsyncpa [#allocation9], 0 }
   0x3   :  { %15 = vsyncpa [#allocation4], 0 }
   0x4   :  { %16 = vsyncpa [#allocation13], 0  ;;  %s1122_s21 = smov [#allocation5]   ;;  %s1123_s23 = smov [#allocation8]  }
   0x5   :  { %s34_s22 = sshll.u32 %s1122_s21, 4  ;;  %s58_s24 = sshll.u32 %s1123_s23, 4  ;;  %s35_s22 = int_to_ptr.vmem [resolvable:$true] %s34_s22  ;;  %s59_s24 = int_to_ptr.vmem [resolvable:$true] %s58_s24 }
   0x6   :  { %s980_s25 = scalar_lea.vmem %s35_s22, 256  ;;  %p985_p1 = scmp.lt.s32.totalorder %s35_s22, %s35_s22 }
   0x7   :  { %p981_p0 = scmp.ne.s32.totalorder %s35_s22, %s980_s25  ;;  %p986_p2 = scmp.lt.s32.totalorder %s980_s25, %s980_s25 }
   0x9   :  { %p987_p3 = por %p986_p2, %p985_p1 }
   0xb   :  { %p988_p4 = pnand %p987_p3, %p981_p0 }
   0xd   :  { %991 = shalt.err (!%p988_p4)
}
   0xe   :  { %s1124_s26 = smov 128   ;;  %s1125_s27 = smov 8  }
   0xf   :  { %40 = dma.hbm_to_vmem [thread:$0]  %s1295_s1, 256, %s35_s22, [#allocation6], %s1124_s26, %s1124_s26, %s1125_s27  }
  0x10   :  { %s1000_s30 = scalar_lea.vmem %s59_s24, 512  ;;  %p1005_p6 = scmp.lt.s32.totalorder %s59_s24, %s59_s24 }
  0x11   :  { %p1001_p5 = scmp.ne.s32.totalorder %s59_s24, %s1000_s30  ;;  %p1006_p7 = scmp.lt.s32.totalorder %s1000_s30, %s1000_s30 }
  0x13   :  { %p1007_p8 = por %p1006_p7, %p1005_p6 }
  0x15   :  { %p1008_p9 = pnand %p1007_p8, %p1001_p5 }
  0x17   :  { %1011 = shalt.err (!%p1008_p9)
}
  0x18   :  { %64 = dma.hbm_to_vmem [thread:$0]  %s1297_s3, 512, %s59_s24, [#allocation9], %s1124_s26, %s1124_s26, %s1125_s27  }
  0x19   :  { %s1126_s9 = smov [#allocation2]   ;;  %s1127_s11 = smov [#allocation7]  }
  0x1a   :  { %s22_s10 = sshll.u32 %s1126_s9, 4  ;;  %s46_s12 = sshll.u32 %s1127_s11, 4  ;;  %s23_s10 = int_to_ptr.vmem [resolvable:$true] %s22_s10  ;;  %s47_s12 = int_to_ptr.vmem [resolvable:$true] %s46_s12 }
  0x1b   :  { %s1020_s1 = scalar_lea.vmem %s23_s10, 256  ;;  %p1025_p11 = scmp.lt.s32.totalorder %s23_s10, %s23_s10 }
  0x1c   :  { %p1021_p10 = scmp.ne.s32.totalorder %s23_s10, %s1020_s1  ;;  %p1026_p12 = scmp.lt.s32.totalorder %s1020_s1, %s1020_s1 }
  0x1e   :  { %p1027_p13 = por %p1026_p12, %p1025_p11 }
  0x20   :  { %p1028_p0 = pnand %p1027_p13, %p1021_p10 }
  0x22   :  { %1031 = shalt.err (!%p1028_p0)
}
  0x23   :  { %28 = dma.hbm_to_vmem [thread:$0]  %s1294_s0, 256, %s23_s10, [#allocation3], %s1124_s26, %s1124_s26, %s1125_s27  }
  0x24   :  { %s1040_s3 = scalar_lea.vmem %s47_s12, 512  ;;  %p1045_p2 = scmp.lt.s32.totalorder %s47_s12, %s47_s12 }
  0x25   :  { %p1041_p1 = scmp.ne.s32.totalorder %s47_s12, %s1040_s3  ;;  %p1046_p3 = scmp.lt.s32.totalorder %s1040_s3, %s1040_s3 }
  0x27   :  { %p1047_p4 = por %p1046_p3, %p1045_p2 }
  0x29   :  { %p1048_p5 = pnand %p1047_p4, %p1041_p1 }
  0x2b   :  { %1051 = shalt.err (!%p1048_p5)
}
  0x2c   :  { %52 = dma.hbm_to_vmem [thread:$0]  %s1296_s2, 512, %s47_s12, [#allocation6], %s1124_s26, %s1124_s26, %s1125_s27  }
  0x2d   :  { %s1128_s17 = smov [#allocation10]  }
  0x2e   :  { %s70_s18 = sshll.u32 %s1128_s17, 4  ;;  %s71_s18 = int_to_ptr.vmem [resolvable:$true] %s70_s18 }
  0x2f   :  { %s1060_s19 = scalar_lea.vmem %s71_s18, 512  ;;  %p1065_p7 = scmp.lt.s32.totalorder %s71_s18, %s71_s18 }
  0x30   :  { %p1061_p6 = scmp.ne.s32.totalorder %s71_s18, %s1060_s19  ;;  %p1066_p8 = scmp.lt.s32.totalorder %s1060_s19, %s1060_s19 }
  0x32   :  { %p1067_p9 = por %p1066_p8, %p1065_p7 }
  0x34   :  { %p1068_p10 = pnand %p1067_p9, %p1061_p6 }
  0x36   :  { %1071 = shalt.err (!%p1068_p10)
}
  0x37   :  { %76 = dma.hbm_to_vmem [thread:$0]  %s1298_s4, 512, %s71_s18, [#allocation9], %s1124_s26, %s1124_s26, %s1125_s27  }
  0x38   :  { %1112 = dma.done.wait [#allocation3], 256  }
  0x39   :  { %1113 = vsyncadd [#allocation3], 4294967040 }
  0x3a   :  { %1114 = dma.done.wait [#allocation6], 768  }
  0x3b   :  { %1115 = vsyncadd [#allocation6], 4294966528 }
  0x3c   :  { %1116 = dma.done.wait [#allocation9], 1024  }
  0x3d   :  { %1117 = vsyncadd [#allocation9], 4294966272  ;;  %v1129_v0 = vmov 0.0   ;;  %vm100_vm0 = vcmask 261120   ;;  %v99_v1 = vld [vmem:[#allocation7 + $0x18] sm:$0xff]  ;;  %v98_v2 = vld [vmem:[#allocation7 + $0x10] sm:$0xff]  ;;  %v673_v33 = vlaneseq }
  0x3e   :  { %903 = vmatprep.subr.mxu1 %v1129_v0  ;;  %892 = vmatprep.subr.mxu0 %v99_v1  ;;  %v1203_v3 = vld [vmem:[#allocation2] sm:$0xff]  ;;  %v97_v4 = vld [vmem:[#allocation7 + $0x8] sm:$0xff]  ;;  %v94_v5 = vld [vmem:[#allocation5] sm:$0xff]  ;;  %vm1130_vm1 = vmmov 0   ;;  %vm334_vm2 = vcmask 64512   ;;  %vm810_vm3 = vcmask 58368  }
  0x3f   :  { %893 = vmatpush3.msra.mxu0 %v99_v1  ;;  %900 = vmatprep.mubr.msk.f32.mxu0 %vm100_vm0, %v1203_v3  ;;  %v96_v6 = vld [vmem:[#allocation7] sm:$0xff]  ;;  %v1209_v7 = vld [vmem:[#allocation2 + $0x8] sm:$0xff]  ;;  %v95_v9 = vld [vmem:[#allocation5 + $0x8] sm:$0xff]  ;;  %v1131_v31 = vmov 1983009808   ;;  %v674_v37 = vshrl.u32 %v673_v33, 7 }
  0x40   :  { %894 = vmatprep.subr.mxu0 %v98_v2  ;;  %904 = vmatpush3.xpose.msk.msra.mxu1 %vm100_vm0, %v94_v5  ;;  %v510_v27 = vld [vmem:[#allocation10 + $0x18] sm:$0xff]  ;;  %v671_v32 = vunpack.c.l.s4 %v1131_v31  ;;  %v1132_v34 = vmov 1934713408   ;;  %v509_v41 = vld [vmem:[#allocation10 + $0x10] sm:$0xff]  ;;  %v508_v44 = vld [vmem:[#allocation10 + $0x8] sm:$0xff]  ;;  %s1133_s2 = smov [#allocation12]  }
  0x41   :  { %895 = vmatpush3.msra.mxu0 %v98_v2  ;;  %908 = vmatprep.subr.mxu1 %v1129_v0  ;;  %v506_v28 = vld [vmem:[#allocation8 + $0x18] sm:$0xff]  ;;  %v702_v35 = vunpack.c.l.s4 %v1132_v34  ;;  %v505_v48 = vld [vmem:[#allocation8 + $0x10] sm:$0xff]  ;;  %s836_s4 = sshll.u32 %s1133_s2, 4  ;;  %s837_s4 = int_to_ptr.vmem [resolvable:$true] %s836_s4 }
  0x42   :  { %896 = vmatprep.subr.mxu0 %v97_v4  ;;  %905 = vmatprep.mubr.msk.f32.mxu1 %vm1130_vm1, %v1129_v0  ;;  %v672_v36 = vunpack.c.0.s8 %v671_v32  ;;  %s1072_s21 = scalar_lea.vmem %s837_s4, 256  ;;  %p1077_p12 = scmp.lt.s32.totalorder %s837_s4, %s837_s4 }
  0x43   :  { %897 = vmatpush3.msra.mxu0 %v97_v4  ;;  %v703_v40 = vunpack.c.0.s8 %v702_v35  ;;  %v504_v4 = vld [vmem:[#allocation8 + $0x8] sm:$0xff]  ;;  %p1073_p11 = scmp.ne.s32.totalorder %s837_s4, %s1072_s21  ;;  %p1078_p13 = scmp.lt.s32.totalorder %s1072_s21, %s1072_s21 }
  0x44   :  { %898 = vmatprep.subr.mxu0 %v96_v6  ;;  %v1227_v42 = vsub.s32 %v672_v36, %v674_v37 }
  0x45   :  { %899 = vmatpush3.msra.mxu0 %v96_v6  ;;  %v1232_v47 = vsub.s32 %v703_v40, %v674_v37  ;;  %p1079_p0 = por %p1078_p13, %p1077_p12 }
  0x46   :  { %901 = vmatmul.mubr.msk.f32.vlgmr.msra.gmra.mxu0 %vm100_vm0, %v1209_v7  ;;  %913 = vmatprep.subr.mxu0 %v1129_v0 }
  0x47   :  { %914 = vmatpush3.msra.mxu0 %v94_v5  ;;  %915 = vmatprep.mubr.msk.f32.mxu0 %vm1130_vm1, %v1129_v0  ;;  %v503_v5 = vld [vmem:[#allocation8] sm:$0xff]  ;;  %p1080_p1 = pnand %p1079_p0, %p1073_p11 }
  0x48   :  { %923 = vmatprep.subr.mxu0 %v510_v27 }
 0x106   :  { %v902_v8 = vpop.f32.mrf.mxu0 }
 0x108   :  { %v173_v10 = vpop.f32.mrf.mxu0 }
 0x109   :  { %906 = vmatmul.mubr.msk.f32.vlgmr.msra.gmra.mxu1 %vm100_vm0, %v173_v10 }
 0x10a   :  { %909 = vmatpush3.xpose.msk.msra.mxu1 %vm100_vm0, %v95_v9  ;;  %910 = vmatprep.mubr.msk.f32.mxu1 %vm1130_vm1, %v1129_v0 }
 0x10b   :  { %918 = vmatprep.subr.mxu1 %v1129_v0 }
 0x10d   :  { %911 = vmatmul.mubr.msk.f32.vlgmr.msra.gmra.mxu1 %vm100_vm0, %v902_v8 }
 0x10e   :  { %919 = vmatpush3.msra.mxu1 %v95_v9  ;;  %920 = vmatprep.mubr.msk.f32.mxu1 %vm1130_vm1, %v1129_v0 }
 0x10f   :  { %934 = vmatprep.subr.mxu1 %v506_v28 }
 0x1c9   :  { %v254_v11 = vpop.f32.mrf.mxu1 }
 0x1ca   :  { %v335_v12 = vsel %vm334_vm2, %v254_v11, -inf }
 0x1cb   :  { %336 = vmax.xlane.f32.xlu0 %v335_v12  ;;  %v907_v13 = vpop.f32.mrf.mxu1 }
 0x1cd   :  { %v330_v14 = vpop.f32.mrf.mxu1 }
 0x1ce   :  { %v338_v15 = vsel %vm334_vm2, %v330_v14, -inf }
 0x1cf   :  { %339 = vmax.xlane.f32.xlu0 %v338_v15  ;;  %v912_v16 = vpop.f32.mrf.mxu1 }
 0x254   :  { %v337_v17 = vpop.xlane.xlu0 %336 }
 0x255   :  { %v341_v18 = vsub.f32 %v254_v11, %v337_v17 }
 0x257   :  { %v343_v19 = vmul.f32 1.442695, %v341_v18 }
 0x258   :  { %v340_v20 = vpop.xlane.xlu0 %339 }
 0x259   :  { %960 = vpow2.f32 %v343_v19  ;;  %v342_v21 = vsub.f32 %v330_v14, %v340_v20 }
 0x25b   :  { %v345_v22 = vmul.f32 1.442695, %v342_v21 }
 0x25d   :  { %962 = vpow2.f32 %v345_v22 }
 0x266   :  { %v961_v23 = vpop.eup %960 }
 0x267   :  { %v347_v24 = vsel %vm334_vm2, %v961_v23, 0.0 }
 0x268   :  { %348 = vadd.xlane.f32.xlu1 %v347_v24 }
 0x26a   :  { %v963_v25 = vpop.eup %962 }
 0x26b   :  { %v350_v26 = vsel %vm334_vm2, %v963_v25, 0.0 }
 0x26c   :  { %351 = vadd.xlane.f32.xlu1 %v350_v26 }
 0x2f1   :  { %v349_v29 = vpop.xlane.xlu1 %348 }
 0x2f2   :  { %964 = vrcp.f32 %v349_v29 }
 0x2f5   :  { %v352_v30 = vpop.xlane.xlu1 %351 }
 0x2f6   :  { %966 = vrcp.f32 %v352_v30 }
 0x2ff   :  { %v965_v38 = vpop.eup %964 }
 0x300   :  { %v355_v39 = vmul.f32 %v965_v38, %v961_v23 }
 0x302   :  { %916 = vmatmul.mubr.msk.f32.vlgmr.msra.gmra.mxu0 %vm334_vm2, %v355_v39  ;;  %v744_v45 = vcombine.high %v355_v39, %v1129_v0  ;;  %v751_v49 = vrot.slane %v355_v39, %v1227_v42 }
 0x303   :  { %v967_v43 = vpop.eup %966  ;;  %924 = vmatpush3.msra.mxu0 %v510_v27  ;;  %931 = vmatprep.mubr.msk.f32.mxu0 %vm100_vm0, %v1203_v3  ;;  %v507_v3 = vld [vmem:[#allocation10] sm:$0xff] }
 0x304   :  { %v356_v46 = vmul.f32 %v967_v43, %v963_v25  ;;  %925 = vmatprep.subr.mxu0 %v509_v41  ;;  %v758_v52 = vrot.slane %v744_v45, %v1227_v42 }
 0x305   :  { %926 = vmatpush3.msra.mxu0 %v509_v41 }
 0x306   :  { %921 = vmatmul.mubr.msk.f32.vlgmr.msra.gmra.mxu1 %vm334_vm2, %v356_v46  ;;  %v759_v50 = vcombine.high %v356_v46, %v1129_v0  ;;  %v766_v51 = vrot.slane %v356_v46, %v1227_v42  ;;  %927 = vmatprep.subr.mxu0 %v508_v44 }
 0x307   :  { %935 = vmatpush3.msra.mxu1 %v506_v28  ;;  %928 = vmatpush3.msra.mxu0 %v508_v44 }
 0x308   :  { %v773_v53 = vrot.slane %v759_v50, %v1227_v42  ;;  %v774_v54 = vcombine.low %v751_v49, %v766_v51  ;;  %v775_v55 = vcombine.high %v751_v49, %v766_v51  ;;  %936 = vmatprep.subr.mxu1 %v505_v48  ;;  %929 = vmatprep.subr.mxu0 %v507_v3 }
 0x309   :  { %937 = vmatpush3.msra.mxu1 %v505_v48  ;;  %930 = vmatpush3.msra.mxu0 %v507_v3 }
 0x30a   :  { %v782_v56 = vrot.slane %v774_v54, %v1232_v47  ;;  %v789_v57 = vrot.slane %v775_v55, %v1232_v47  ;;  %v790_v58 = vcombine.low %v758_v52, %v773_v53  ;;  %v791_v59 = vcombine.high %v758_v52, %v773_v53  ;;  %938 = vmatprep.subr.mxu1 %v504_v4 }
 0x30b   :  { %939 = vmatpush3.msra.mxu1 %v504_v4  ;;  %932 = vmatmul.mubr.msk.f32.vlgmr.msra.gmra.mxu0 %vm100_vm0, %v1209_v7 }
 0x30c   :  { %v798_v60 = vrot.slane %v790_v58, %v1232_v47  ;;  %v805_v61 = vrot.slane %v791_v59, %v1232_v47  ;;  %v806_v62 = vcombine.high %v782_v56, %v1129_v0  ;;  %v807_v63 = vcombine.high %v789_v57, %v1129_v0  ;;  %811 = vst.msk [vmem:[#allocation12] sm:$0x3] %vm810_vm3, %v782_v56 }
 0x30d   :  { %813 = vst.msk [vmem:[#allocation12 + $0x4] sm:$0x3] %vm810_vm3, %v789_v57  ;;  %940 = vmatprep.subr.mxu1 %v503_v5 }
 0x30e   :  { %v808_v1 = vcombine.high %v798_v60, %v1129_v0  ;;  %v809_v2 = vcombine.high %v805_v61, %v1129_v0  ;;  %812 = vst.msk [vmem:[#allocation12 + $0x2] sm:$0x3] %vm810_vm3, %v806_v62  ;;  %814 = vst.msk [vmem:[#allocation12 + $0x6] sm:$0x3] %vm810_vm3, %v807_v63  ;;  %941 = vmatpush3.msra.mxu1 %v503_v5 }
 0x30f   :  { %815 = vst.msk [vmem:[#allocation12 + $0x8] sm:$0x3] %vm810_vm3, %v798_v60  ;;  %817 = vst.msk [vmem:[#allocation12 + $0xc] sm:$0x3] %vm810_vm3, %v805_v61 }
 0x310   :  { %816 = vst.msk [vmem:[#allocation12 + $0xa] sm:$0x3] %vm810_vm3, %v808_v1  ;;  %818 = vst.msk [vmem:[#allocation12 + $0xe] sm:$0x3] %vm810_vm3, %v809_v2 }
 0x3c2   :  { %v426_v6 = vpop.f32.mrf.mxu0 }
 0x3c3   :  { %942 = vmatprep.mubr.msk.f32.mxu1 %vm100_vm0, %v426_v6 }
 0x3c4   :  { %v917_v8 = vpop.f32.mrf.mxu0 }
 0x3c6   :  { %v499_v9 = vpop.f32.mrf.mxu1 }
 0x3c7   :  { %943 = vmatmul.mubr.msk.f32.vlgmr.msra.gmra.mxu1 %vm100_vm0, %v499_v9 }
 0x3c8   :  { %v922_v10 = vpop.f32.mrf.mxu1 }
 0x3c9   :  { %1083 = shalt.err (!%p1080_p1)
}
 0x3ca   :  { %s1134_s22 = smov 32   ;;  %s1135_s23 = smov 2   ;;  %vm735_vm4 = vcmask 254976  }
 0x3cb   :  { %842 = dma.vmem_to_hbm [thread:$0]  %s837_s4, 256, %s1300_s6, [#allocation13], %s1134_s22, %s1134_s22, %s1135_s23   ;;  %v933_v7 = vpop.f32.mrf.mxu0 }
 0x3cc   :  { %s1136_s6 = smov [#allocation11]  }
 0x3cd   :  { %v577_v13 = vpop.f32.mrf.mxu0  ;;  %s824_s26 = sshll.u32 %s1136_s6, 4  ;;  %s825_s26 = int_to_ptr.vmem [resolvable:$true] %s824_s26 }
 0x3ce   :  { %s1092_s27 = scalar_lea.vmem %s825_s26, 256  ;;  %p1097_p3 = scmp.lt.s32.totalorder %s825_s26, %s825_s26 }
 0x3cf   :  { %p1093_p2 = scmp.ne.s32.totalorder %s825_s26, %s1092_s27  ;;  %p1098_p4 = scmp.lt.s32.totalorder %s1092_s27, %s1092_s27 }
 0x3d1   :  { %p1099_p5 = por %p1098_p4, %p1097_p3 }
 0x3d3   :  { %p1100_p6 = pnand %p1099_p5, %p1093_p2 }
 0x487   :  { %v944_v11 = vpop.f32.mrf.mxu1 }
 0x488   :  { %v664_v12 = vadd.f32 %v944_v11, %v933_v7 }
 0x489   :  { %v658_v14 = vpop.f32.mrf.mxu1 }
 0x48a   :  { %968 = vtanh.f32 %v664_v12  ;;  %v659_v15 = vadd.f32 %v658_v14, %v577_v13 }
 0x48c   :  { %970 = vtanh.f32 %v659_v15 }
 0x497   :  { %v969_v16 = vpop.eup %968 }
 0x498   :  { %v684_v17 = vcombine.high %v969_v16, %v1129_v0  ;;  %v691_v19 = vrot.slane %v969_v16, %v1227_v42 }
 0x499   :  { %v971_v18 = vpop.eup %970 }
 0x49a   :  { %v669_v20 = vcombine.high %v971_v18, %v1129_v0  ;;  %v676_v21 = vrot.slane %v971_v18, %v1227_v42  ;;  %v698_v22 = vrot.slane %v684_v17, %v1227_v42 }
 0x49c   :  { %v683_v23 = vrot.slane %v669_v20, %v1227_v42  ;;  %v699_v24 = vcombine.low %v676_v21, %v691_v19  ;;  %v700_v25 = vcombine.high %v676_v21, %v691_v19 }
 0x49e   :  { %v707_v26 = vrot.slane %v699_v24, %v1232_v47  ;;  %v714_v27 = vrot.slane %v700_v25, %v1232_v47  ;;  %v715_v28 = vcombine.low %v683_v23, %v698_v22  ;;  %v716_v29 = vcombine.high %v683_v23, %v698_v22 }
 0x4a0   :  { %v723_v30 = vrot.slane %v715_v28, %v1232_v47  ;;  %v730_v31 = vrot.slane %v716_v29, %v1232_v47  ;;  %v731_v32 = vcombine.high %v707_v26, %v1129_v0  ;;  %v732_v33 = vcombine.high %v714_v27, %v1129_v0  ;;  %736 = vst.msk [vmem:[#allocation11] sm:$0x3] %vm735_vm4, %v707_v26 }
 0x4a1   :  { %738 = vst.msk [vmem:[#allocation11 + $0x4] sm:$0x3] %vm735_vm4, %v714_v27 }
 0x4a2   :  { %v733_v34 = vcombine.high %v723_v30, %v1129_v0  ;;  %v734_v35 = vcombine.high %v730_v31, %v1129_v0  ;;  %737 = vst.msk [vmem:[#allocation11 + $0x2] sm:$0x3] %vm735_vm4, %v731_v32  ;;  %739 = vst.msk [vmem:[#allocation11 + $0x6] sm:$0x3] %vm735_vm4, %v732_v33 }
 0x4a3   :  { %740 = vst.msk [vmem:[#allocation11 + $0x8] sm:$0x3] %vm735_vm4, %v723_v30  ;;  %742 = vst.msk [vmem:[#allocation11 + $0xc] sm:$0x3] %vm735_vm4, %v730_v31 }
 0x4a4   :  { %741 = vst.msk [vmem:[#allocation11 + $0xa] sm:$0x3] %vm735_vm4, %v733_v34  ;;  %743 = vst.msk [vmem:[#allocation11 + $0xe] sm:$0x3] %vm735_vm4, %v734_v35 }
 0x4a5   :  { %1103 = shalt.err (!%p1100_p6)
}
 0x4a6   :  { %830 = dma.vmem_to_hbm [thread:$0]  %s825_s26, 256, %s1299_s5, [#allocation4], %s1134_s22, %s1134_s22, %s1135_s23  }
 0x4a7   :  { %1118 = dma.done.wait [#allocation4], 256  }
 0x4a8   :  { %1119 = vsyncadd [#allocation4], 4294967040 }
 0x4a9   :  { %1120 = dma.done.wait [#allocation13], 256  }
 0x4aa   :  { %1121 = vsyncadd [#allocation13], 4294967040 }
 0x4ab   :  { %849 = vsyncpa [#allocation3], 1 }
 0x4ac   :  { %850 = vsyncpa [#allocation6], 1 }
 0x4ad   :  { %851 = vsyncpa [#allocation9], 1 }
 0x4ae   :  { %852 = vsyncpa [#allocation4], 1 }
 0x4af   :  { %853 = vsyncpa [#allocation13], 1 }

</bundles_post_ra>
